<compile_context>
chip_gen: v5e
topology: v5e:2x2
jax: 0.10.0
libtpu: 0.0.40
codegen_flags: <defaults>
</compile_context>

<pallas_src>
import jax
import jax.numpy as jnp
from jax.experimental import pallas as pl
from jax.experimental.pallas import tpu as pltpu

_LANE = 128
_SUBLANE = 8


def _round_up(v, m):
    return -(-v // m) * m


def _tile_bytes(rows, cols, itemsize=4):
    """Bytes a (rows, cols) buffer occupies in VMEM's native (8,128) tiling."""
    return _round_up(max(rows, 1), _SUBLANE) * _round_up(max(cols, 1), _LANE) * itemsize


def _vmem_budget():
    """(usable budget, physical capacity) in bytes, generation aware."""
    try:
        phys = int(pltpu.get_tpu_info().vmem_capacity_bytes)
    except Exception:
        phys = 64 * 1024 * 1024  # conservative default: v7x per-TC VMEM
    return int(0.70 * phys), phys


def _pick_tile_rows(rows, in_cols, out_cols, budget, max_tile=1024):
    """Largest multiple-of-8 row tile whose pipelined footprint fits `budget`.

    Footprint = 2x x tile + 2x out tile (double-buffered) + 2x resident weight,
    each rounded up to the (8,128) native VMEM layout.  The tile is capped at
    rows//2 (when rows >= 16) so the parallel grid axis has >= 2 steps for
    v7x's two TensorCores.  Among fitting tiles we prefer the one needing the
    least row padding (divisors of `rows` win with zero padding).
    """
    w_bytes = 2 * _tile_bytes(in_cols, out_cols)  # resident W, default double-buffered

    def need(t):
        return w_bytes + 2 * _tile_bytes(t, in_cols) + 2 * _tile_bytes(t, out_cols)

    cap = min(max_tile, _round_up(rows, _SUBLANE))
    if rows >= 16:
        cap = min(cap, max(_SUBLANE, (rows // 2) // _SUBLANE * _SUBLANE))
    cap = max(_SUBLANE, cap - cap % _SUBLANE)

    best_t, best_pad = _SUBLANE, None
    t = cap
    while t >= _SUBLANE:
        if int(1.25 * need(t)) <= budget:
            pad = _round_up(rows, t) - rows
            if best_pad is None or pad < best_pad:
                best_t, best_pad = t, pad
        t -= _SUBLANE
    return best_t, need(best_t)


def _fourier_pe_kernel(x_ref, w_ref, o_ref):
    # MXU matmul (tiny K, bias folded into the last weight row)
    # -> sin on the VPU/EUP -> lane-dense (full-128) store.
    z = jnp.dot(x_ref[...], w_ref[...], preferred_element_type=jnp.float32)
    o_ref[...] = jnp.sin(z).astype(o_ref.dtype)


def fourier_pe(x, weight, bias, omega0=1.0, *, out_dtype=jnp.float32, max_tile=1024):
    """FourierPE forward: sin(omega0 * (x @ weight.T + bias)).

    Args:
      x:      (N, input_dim) float32
      weight: (num_atoms, input_dim) float32 (PyTorch nn.Linear layout)
      bias:   (num_atoms,) float32
      omega0: python float frequency factor
      out_dtype: output dtype (f32 default; bf16 halves HBM writeback on v5e/v6e
                 if the consumer tolerates reduced output precision)
    Returns:
      (N, num_atoms) array of `out_dtype`
    """
    N, input_dim = x.shape
    num_atoms = weight.shape[0]

    om = jnp.float32(omega0)
    # sin(w0 * (x W^T + b)) == sin(x (w0 W)^T + w0 b)
    w_t = (om * weight.astype(jnp.float32)).T          # (input_dim, num_atoms)
    b = om * bias.astype(jnp.float32)                  # (num_atoms,)

    # ---- build lane-dense x / W with the bias folded into the matmul ----
    fold, col_pad = 1, 0
    if num_atoms % _LANE == 0:
        x_base = x
        w_base = w_t
        b_row = b[None, :]
    elif _LANE % num_atoms == 0:
        # Pack `fold` batch rows per output row via a block-diagonal weight.
        fold = _LANE // num_atoms
        row_pad_fold = (-N) % fold                      # <= fold-1 zero rows
        x_p = jnp.pad(x, ((0, row_pad_fold), (0, 0))) if row_pad_fold else x
        x_base = x_p.reshape((N + row_pad_fold) // fold, fold * input_dim)
        w_base = jnp.kron(jnp.eye(fold, dtype=jnp.float32), w_t)
        b_row = jnp.tile(b, fold)[None, :]
    else:
        col_pad = (-num_atoms) % _LANE
        x_base = x
        w_base = jnp.pad(w_t, ((0, 0), (0, col_pad)))
        b_row = jnp.pad(b, (0, col_pad))[None, :]

    rows = x_base.shape[0]
    # Bias -> one extra matmul row: ones column on x, b as the last W row.
    x_aug = jnp.concatenate([x_base, jnp.ones((rows, 1), jnp.float32)], axis=1)
    w_aug = jnp.concatenate([w_base, b_row], axis=0)

    in_cols = x_aug.shape[1]
    out_cols = w_aug.shape[1]

    budget, phys = _vmem_budget()
    tile_rows, need = _pick_tile_rows(rows, in_cols, out_cols, budget, max_tile)

    rows_p = _round_up(rows, tile_rows)
    if rows_p != rows:
        x_aug = jnp.pad(x_aug, ((0, rows_p - rows), (0, 0)))
    grid = (rows_p // tile_rows,)

    vmem_limit = max(int(1.25 * need), 16 * 1024 * 1024)
    vmem_limit = min(vmem_limit, int(0.95 * phys))

    out_itemsize = jnp.dtype(out_dtype).itemsize
    cost = pl.CostEstimate(
        flops=2 * rows_p * in_cols * out_cols,
        transcendentals=rows_p * out_cols,
        bytes_accessed=4 * (rows_p * in_cols + in_cols * out_cols)
        + rows_p * out_cols * out_itemsize,
    )

    out = pl.pallas_call(
        _fourier_pe_kernel,
        out_shape=jax.ShapeDtypeStruct((rows_p, out_cols), out_dtype),
        grid_spec=pltpu.PrefetchScalarGridSpec(
            num_scalar_prefetch=0,
            grid=grid,
            in_specs=[
                pl.BlockSpec((tile_rows, in_cols), lambda i: (i, 0)),   # x tile
                pl.BlockSpec((in_cols, out_cols), lambda i: (0, 0)),    # resident W'
            ],
            out_specs=pl.BlockSpec((tile_rows, out_cols), lambda i: (i, 0)),
        ),
        compiler_params=pltpu.CompilerParams(
            dimension_semantics=("parallel",),
            vmem_limit_bytes=vmem_limit,
        ),
        cost_estimate=cost,
    )(x_aug, w_aug)

    # ---- unpack to the module's (N, num_atoms) contract ----
    if fold > 1:
        out = out.reshape(rows_p * fold, num_atoms)     # contiguous, free
        if rows_p * fold != N:
            out = out[:N]
    elif col_pad or rows_p != N:
        # TODO(synk): if the consumer can fuse/ignore the padding, return the
        # padded slab instead; this slice is an extra full pass over the output.
        out = out[:N, :num_atoms]
    return out


if __name__ == "__main__":
    # Module config (small, consistent with the forward semantics)
    input_dim = 4
    num_atoms = 64
    omega0 = 30.0
    N = 128  # number of input points (batch)

    key = jax.random.PRNGKey(0)
    kx, kw, kb = jax.random.split(key, 3)

    # Deterministic parameter init mirroring FourierPE.__init__:
    #   weight ~ U(-1/input_dim, 1/input_dim)  (explicit re-init in FourierPE)
    #   bias   ~ U(-1/sqrt(input_dim), 1/sqrt(input_dim))  (nn.Linear default)
    weight = jax.random.uniform(
        kw, (num_atoms, input_dim), jnp.float32,
        minval=-1.0 / input_dim, maxval=1.0 / input_dim)
    bound = 1.0 / (input_dim ** 0.5)
    bias = jax.random.uniform(
        kb, (num_atoms,), jnp.float32, minval=-bound, maxval=bound)

    x = jax.random.normal(kx, (N, input_dim), jnp.float32)

    out = jax.block_until_ready(fourier_pe(x, weight, bias, omega0))

    # Reference check in plain JAX (original, un-folded formulation).
    ref = jnp.sin(omega0 * (x @ weight.T + bias))
    assert out.shape == (N, num_atoms)
    assert jnp.allclose(out, ref, atol=1e-4, rtol=1e-4), "mismatch vs reference"

    print("KERNEL_OK")
</pallas_src>

<mosaic_0001>
module attributes {stable_mosaic.version = 11 : i64} {
  func.func @_fourier_pe_kernel(%arg0: i32, %arg1: memref<32x9xf32, #tpu.memory_space<vmem>>, %arg2: memref<9x128xf32, #tpu.memory_space<vmem>>, %arg3: memref<32x128xf32, #tpu.memory_space<vmem>>) attributes {dimension_semantics = [#tpu.dimension_semantics<parallel>], iteration_bounds = array<i64: 2>, scalar_prefetch = 0 : i64, scratch_operands = 0 : i64, tpu.core_type = #tpu.core_type<tc>, window_params = [{transform_indices = @transform_0, window_bounds = array<i64: 32, 9>}, {pipeline_mode = #tpu.pipeline_mode<synchronous>, transform_indices = @transform_1, window_bounds = array<i64: 9, 128>}, {transform_indices = @transform_2, window_bounds = array<i64: 32, 128>}]} {
    %c0 = arith.constant 0 : index
    %c0_0 = arith.constant 0 : index
    %0 = vector.load %arg1[%c0, %c0_0] : memref<32x9xf32, #tpu.memory_space<vmem>>, vector<32x9xf32>
    %c0_1 = arith.constant 0 : index
    %c0_2 = arith.constant 0 : index
    %1 = vector.load %arg2[%c0_1, %c0_2] : memref<9x128xf32, #tpu.memory_space<vmem>>, vector<9x128xf32>
    %cst = arith.constant dense<0.000000e+00> : vector<32x128xf32>
    %2 = tpu.matmul %0, %1, %cst {dimension_numbers = #tpu.dot_dimension_numbers<[1], [0], [0], [1], [0, 0, 1, 1], [], []>} : vector<32x9xf32>, vector<9x128xf32>, vector<32x128xf32> -> vector<32x128xf32>
    %3 = math.sin %2 : vector<32x128xf32>
    %c0_3 = arith.constant 0 : index
    %c0_4 = arith.constant 0 : index
    %4 = vector.load %arg3[%c0_3, %c0_4] : memref<32x128xf32, #tpu.memory_space<vmem>>, vector<32x128xf32>
    tpu.vector_store %arg3[%c0_3, %c0_4], %3 {strides = array<i32>} : memref<32x128xf32, #tpu.memory_space<vmem>>, vector<32x128xf32>,
    return
  }
  func.func @transform_0(%arg0: i32) -> (i32, i32) {
    %c0_i32 = arith.constant 0 : i32
    %c0_i32_0 = arith.constant 0 : i32
    return %arg0, %c0_i32 : i32, i32
  }
  func.func @transform_1(%arg0: i32) -> (i32, i32) {
    %c0_i32 = arith.constant 0 : i32
    %c0_i32_0 = arith.constant 0 : i32
    %c0_i32_1 = arith.constant 0 : i32
    return %c0_i32, %c0_i32_0 : i32, i32
  }
  func.func @transform_2(%arg0: i32) -> (i32, i32) {
    %c0_i32 = arith.constant 0 : i32
    %c0_i32_0 = arith.constant 0 : i32
    return %arg0, %c0_i32 : i32, i32
  }
}

</mosaic_0001>

<bundles_post_ra>
// kernel: tpu_custom_call.1
= control target key start
LH: loop header
LB: loop body
LE: loop exit
PB: predicated region body
PF: predicated region fallthrough
CT: control target
= control target key end

     0   :  { %7 = vsyncpa [#allocation3], 0  ;;  %s1588_s0 = inlined_call_operand.vmem [shape: f32[64,9], index: 0, kind: input, shape index: {}]   ;;  %s1589_s1 = inlined_call_operand.vmem [shape: f32[9,128], index: 1, kind: input, shape index: {}]   ;;  %s1590_s2 = inlined_call_operand.hbm [shape: f32[64,128], index: 2, kind: output, shape index: {}]  }
   0x1   :  { %9 = vsyncpa [#allocation3 + $0x1], 0  ;;  %s1071_s9 = smov 0   ;;  %s1073_s10 = smov 0  }
   0x2   :  { %s1075_s11 = smov 0   ;;  %s1077_s12 = smov 0  }
   0x3 LB: > { %s1092_s13 = sadd.s32 4294967295, %s1045_s12   ;;  %s899_s14 = sadd.s32 4294967294, %s1045_s12   ;;  %s1045_s12 = sphi %s1077_s12, %s1602_s12   ;;  %s1041_s11 = sphi %s1075_s11, %s1601_s11   ;;  %s1037_s10 = sphi %s1073_s10, %s1600_s10   ;;  %s1033_s9 = sphi %s1071_s9, %s1599_s9  }
   0x4   : > { %s1096_s15 = sadd.s32 1, %s1045_s12   ;;  %s69_s16 = sadd.s32 1, %s1041_s11 }
   0x5   : > { %s66_s17 = ssub.s32 %s1045_s12, %s1096_s15  ;;  %p79_p0 = scmp.ne.s32.totalorder %s1041_s11, %s1037_s10 }
   0x6   : > { %p67_p1 = scmp.eq.s32.totalorder %s66_s17, 0  ;;  %p80_p2 = scmp.eq.s32.totalorder %s1092_s13, 1 }
   0x7   : > { %p85_p3 = scmp.ne.s32.totalorder %s1037_s10, %s1033_s9  ;;  %p86_p4 = scmp.eq.s32.totalorder %s899_s14, 1 }
   0x8   : > { %s1107_s18 = scalar_select %p67_p1, %s1041_s11, %s69_s16  }
   0x9   : > { %p1109_p5 = por %p80_p2, %p79_p0  ;;  %p1113_p6 = por %p86_p4, %p85_p3 }
   0xa   : > { %p902_p7 = scmp.ge.s32.totalorder %s1045_s12, 1  ;;  %p116_p8 = scmp.lt.s32.totalorder %s1045_s12, 3 }
   0xc   : > { %p117_p9 = pnand %p902_p7, %p116_p8 }
   0xd   : > { %s904_s25 = sshll.u32 (!%p117_p9), %s1092_s13, 2  ;;  %s135_s30 = sand.u32 (!%p117_p9), 1, %s1037_s10  }
   0xe   : > { %120 = sbr.rel (%p117_p9) target bundleno = 345 (0x159), region = 28  ;;  %p139_p10 = scmp.lt.s32.totalorder (!%p117_p9), %s904_s25, 7 }
   0xf   : > { %s903_s3 = sshll.u32 (!%p117_p9), %s135_s30, 5  ;;  %s928_s5 = sshll.u32 (!%p117_p9), %s1092_s13, 5 }
  0x10   : > { %s1438_s4 = scalar_lea.vmem (!%p117_p9), [#allocation2], %s903_s3  ;;  %s833_s8 = scalar_lea.hbm (!%p117_p9), %s1590_s2, %s928_s5 }
  0x11   : > { %s834_s14 = sshll.u32 (!%p117_p9), %s1438_s4, 4  ;;  %s836_s16 = sshll.u32 (!%p117_p9), %s833_s8, 4  ;;  %s835_s14 = int_to_ptr.vmem [resolvable:$true] %s834_s14  ;;  %s837_s16 = int_to_ptr.hbm [resolvable:$true] %s836_s16 }
  0x12   : > { %s822_s13 = scalar_lea.sflag (!%p117_p9), [#allocation3], %s135_s30  ;;  %s997_s17 = sshra.s32 (!%p117_p9), %s837_s16, 4  ;;  %s998_s17 = int_to_ptr.hbm [resolvable:$true] %s997_s17 }
  0x13   : > { %v150_v0 = vld [vmem:[%s1589_s1 + $0x8] sm:$0x1]  ;;  %vm164_vm0 = vcmask 1040384   ;;  %v149_v1 = vld [vmem:[%s1589_s1] sm:$0xff]  ;;  %s1604_s25 = smov (!%p139_p10, %s904_s25), 7  ;;  %vm151_vm1 = vcmask 72704   ;;  %p1004_p0 = scmp.lt.s32.totalorder %s998_s17, %s1590_s2 }
  0x14   : > { %906 = vmatpush.msk.msra.mxu0 %vm164_vm0, %v150_v0  ;;  %929 = vmatpush.msk.msra.mxu1 %vm164_vm0, %v150_v0  ;;  %s905_s26 = sshll.u32 %s1604_s25, 3  ;;  %v1047_v29 = vmov 683565275   ;;  %v1048_v31 = vmov 2475754826   ;;  %s999_s21 = scalar_lea.hbm %s998_s17, 32 }
  0x15   : > { %930 = vmatpush.msk.msra.mxu2 %vm164_vm0, %v150_v0  ;;  %931 = vmatpush.msk.msra.mxu3 %vm164_vm0, %v150_v0  ;;  %s142_s29 = scalar_lea.vmem %s1588_s0, %s905_s26  ;;  %v1049_v33 = vmov 2131351028   ;;  %v1050_v35 = vmov 2102212464   ;;  %v1051_v37 = vmov 920167782   ;;  %p1000_p11 = scmp.ne.s32.totalorder %s998_s17, %s999_s21 }
  0x16   : > { %183 = vmatpush.msra.mxu0 %v149_v1  ;;  %932 = vmatpush.msra.mxu1 %v149_v1  ;;  %v145_v2 = vld [vmem:[%s142_s29] sm:$0xff]  ;;  %v146_v3 = vld [vmem:[%s142_s29 + $0x8] sm:$0xff]  ;;  %v147_v4 = vld [vmem:[%s142_s29 + $0x10] sm:$0xff]  ;;  %v1052_v47 = vmov 1326507024   ;;  %s1003_s24 = scalar_lea.hbm %s1590_s2, 64 }
  0x17   : > { %933 = vmatpush.msra.mxu2 %v149_v1  ;;  %934 = vmatpush.msra.mxu3 %v149_v1  ;;  %v148_v5 = vld [vmem:[%s142_s29 + $0x18] sm:$0xff]  ;;  %p1001_p12 = pnand %p1000_p11, %p1109_p5  ;;  %p1005_p1 = scmp.lt.s32.totalorder %s1003_s24, %s999_s21 }
  0x18   : > { %907 = vmatmul.msk.f32.vlgmr.msra.gmra.mxu0 %vm151_vm1, %v145_v2  ;;  %908 = vmatmul.msk.f32.vlgmr.msra.gmra.mxu1 %vm151_vm1, %v146_v3 }
  0x19   : > { %909 = vmatmul.msk.f32.vlgmr.msra.gmra.mxu2 %vm151_vm1, %v147_v4  ;;  %910 = vmatmul.msk.f32.vlgmr.msra.gmra.mxu3 %vm151_vm1, %v148_v5  ;;  %p1002_p13 = pneg %p1001_p12  ;;  %p1006_p2 = por %p1005_p1, %p1004_p0 }
  0x1b   : > { %p1007_p3 = pnand %p1006_p2, %p1002_p13 }
  0x95   : > { %v1129_v6 = vpop.f32.mrf.mxu0  ;;  %v1131_v7 = vpop.f32.mrf.mxu1 }
  0x96   : > { %v197_v8 = vand.u32 2147483647, %v1129_v6  ;;  %v200_v9 = vand.u32 2139095040, %v1129_v6  ;;  %v352_v10 = vand.u32 2147483647, %v1131_v7  ;;  %v355_v11 = vand.u32 2139095040, %v1131_v7 }
  0x98   : > { %v201_v12 = vshrl.u32 %v200_v9, 23  ;;  %v204_v13 = vand.u32 8388607, %v197_v8  ;;  %v356_v14 = vshrl.u32 %v355_v11, 23  ;;  %v359_v18 = vand.u32 8388607, %v352_v10 }
  0x9a   : > { %v911_v15 = vadd.s32 4294967169, %v201_v12  ;;  %v205_v16 = vor.u32 8388608, %v204_v13  ;;  %v914_v17 = vadd.s32 4294967169, %v356_v14  ;;  %v360_v23 = vor.u32 8388608, %v359_v18 }
  0x9c   : > { %v207_v19 = vadd.s32 1, %v911_v15  ;;  %v362_v20 = vadd.s32 1, %v914_v17  ;;  %v1141_v22 = vshll.u32 %v205_v16, 8  ;;  %v1153_v40 = vshll.u32 %v360_v23, 8  ;;  %v1159_v45 = vpop.f32.mrf.mxu2 }
  0x9d   : > { %v510_v55 = vand.u32 2139095040, %v1159_v45 }
  0x9e   : > { %vm208_vm2 = vcmp.gt.s32.totalorder %v207_v19, 0  ;;  %vm363_vm3 = vcmp.gt.s32.totalorder %v362_v20, 0  ;;  %v246_v39 = vand.u32 65535, %v1141_v22  ;;  %v247_v44 = vshrl.u32 %v1141_v22, 16 }
  0x9f   : > { %v209_v21 = vsel %vm208_vm2, %v207_v19, 0  ;;  %v364_v25 = vsel %vm363_vm3, %v362_v20, 0  ;;  %v1199_v9 = vand.u32 65535, %v1153_v40 }
  0xa0   : > { %v211_v24 = vand.u32 31, %v209_v21  ;;  %v1143_v26 = vshrl.u32 %v209_v21, 5  ;;  %v1145_v27 = vand.u32 31, %v364_v25  ;;  %v1205_v17 = vshrl.u32 %v364_v25, 5 }
  0xa2   : > { %v212_v28 = vsub.s32 32, %v211_v24  ;;  %v214_v30 = vshll.u32 %v1047_v29, %v211_v24  ;;  %v217_v32 = vshll.u32 %v1048_v31, %v211_v24  ;;  %v220_v34 = vshll.u32 %v1049_v33, %v211_v24 }
  0xa3   : > { %v223_v36 = vshll.u32 %v1050_v35, %v211_v24  ;;  %v226_v38 = vshll.u32 %v1051_v37, %v211_v24  ;;  %vm229_vm4 = vcmp.lt.s32.totalorder %v1143_v26, 1  ;;  %vm232_vm5 = vcmp.lt.s32.totalorder %v1143_v26, 4 }
  0xa4   : > { %v215_v41 = vshrl.u32 %v1048_v31, %v212_v28  ;;  %v218_v42 = vshrl.u32 %v1049_v33, %v212_v28  ;;  %v221_v43 = vshrl.u32 %v1050_v35, %v212_v28  ;;  %v224_v46 = vshrl.u32 %v1051_v37, %v212_v28 }
  0xa5   : > { %v227_v48 = vshrl.u32 %v1052_v47, %v212_v28  ;;  %v1166_v52 = vsub.s32 32, %v1145_v27  ;;  %vm231_vm6 = vcmp.lt.s32.totalorder %v1143_v26, 3  ;;  %v213_v56 = vshrl.u32 %v1047_v29, %v212_v28 }
  0xa6   : > { %v216_v49 = vor.u32 %v215_v41, %v214_v30  ;;  %v219_v50 = vor.u32 %v218_v42, %v217_v32  ;;  %v222_v51 = vor.u32 %v221_v43, %v220_v34  ;;  %v225_v53 = vor.u32 %v224_v46, %v223_v36 }
  0xa7   : > { %v228_v54 = vor.u32 %v227_v48, %v226_v38  ;;  %vm230_vm7 = vcmp.lt.s32.totalorder %v1143_v26, 2  ;;  %v369_v61 = vshll.u32 %v1047_v29, %v1145_v27  ;;  %v372_v62 = vshll.u32 %v1048_v31, %v1145_v27 }
  0xa8   : > { %v237_v57 = vsel %vm229_vm4, %v216_v49, %v219_v50  ;;  %v241_v58 = vsel %vm229_vm4, %v219_v50, %v222_v51  ;;  %v238_v59 = vsel %vm232_vm5, %v225_v53, 920167782  ;;  %v234_v63 = vsel %vm232_vm5, %v222_v51, 2102212464 }
  0xa9   : > { %v242_v60 = vsel %vm232_vm5, %v228_v54, 1326507024  ;;  %v239_v0 = vsel %vm231_vm6, %v222_v51, %v238_v59  ;;  %v370_v2 = vshrl.u32 %v1048_v31, %v1166_v52  ;;  %v373_v5 = vshrl.u32 %v1049_v33, %v1166_v52 }
  0xaa   : > { %v243_v1 = vsel %vm231_vm6, %v225_v53, %v242_v60  ;;  %v240_v3 = vsel %vm230_vm7, %v237_v57, %v239_v0  ;;  %v233_v15 = vsel %vm229_vm4, %v213_v56, %v216_v49  ;;  %v235_v16 = vsel %vm231_vm6, %v219_v50, %v234_v63 }
  0xab   : > { %v244_v4 = vsel %vm230_vm7, %v241_v58, %v243_v1  ;;  %v270_v13 = vand.u32 65535, %v240_v3  ;;  %v271_v14 = vshrl.u32 %v240_v3, 16  ;;  %v1207_v18 = vor.u32 %v370_v2, %v369_v61 }
  0xac   : > { %v248_v11 = vand.u32 65535, %v244_v4  ;;  %v249_v12 = vshrl.u32 %v244_v4, 16  ;;  %v1209_v21 = vor.u32 %v373_v5, %v372_v62  ;;  %v375_v23 = vshll.u32 %v1049_v33, %v1145_v27 }
  0xad   : > { %v273_v28 = vmul.u32 %v271_v14, %v246_v39  ;;  %v274_v30 = vmul.u32 %v270_v13, %v247_v44  ;;  %v376_v32 = vshrl.u32 %v1050_v35, %v1166_v52  ;;  %v272_v38 = vmul.u32 %v270_v13, %v246_v39 }
  0xae   : > { %v251_v19 = vmul.u32 %v249_v12, %v246_v39  ;;  %v252_v20 = vmul.u32 %v248_v11, %v247_v44  ;;  %v250_v24 = vmul.u32 %v248_v11, %v246_v39  ;;  %v253_v34 = vmul.u32 %v249_v12, %v247_v44 }
  0xaf   : > { %v275_v25 = vmul.u32 %v271_v14, %v247_v44  ;;  %v276_v46 = vshll.u32 %v273_v28, 16  ;;  %v278_v49 = vshll.u32 %v274_v30, 16  ;;  %v378_v50 = vshll.u32 %v1050_v35, %v1145_v27 }
  0xb0   : > { %v254_v36 = vshll.u32 %v251_v19, 16  ;;  %v255_v41 = vshrl.u32 %v251_v19, 16  ;;  %v256_v42 = vshll.u32 %v252_v20, 16  ;;  %v257_v43 = vshrl.u32 %v252_v20, 16 }
  0xb1   : > { %v1053_v51 = vmov 0   ;;  %vm280_vm9 = vc.u32 %v272_v38, %v276_v46  ;;  %v282_v54 = vadd.s32 %v276_v46, %v272_v38  ;;  %v379_v56 = vshrl.u32 %v1051_v37, %v1166_v52 }
  0xb2   : > { %vm258_vm8 = vc.u32 %v250_v24, %v254_v36  ;;  %v260_v48 = vadd.s32 %v254_v36, %v250_v24  ;;  %v281_v44 = vsel %vm280_vm9, 1, %v1053_v51  ;;  %v381_v57 = vshll.u32 %v1051_v37, %v1145_v27 }
  0xb3   : > { %v259_v53 = vsel %vm258_vm8, 1, %v1053_v51  ;;  %v283_v59 = vadd.s32 %v281_v44, %v275_v25  ;;  %vm284_vm11 = vc.u32 %v282_v54, %v278_v49  ;;  %v377_v60 = vor.u32 %v376_v32, %v375_v23 }
  0xb4   : > { %v261_v39 = vadd.s32 %v259_v53, %v253_v34  ;;  %vm262_vm10 = vc.u32 %v260_v48, %v256_v42  ;;  %v285_v62 = vsel %vm284_vm11, 1, %v1053_v51  ;;  %v380_v63 = vor.u32 %v379_v56, %v378_v50 }
  0xb5   : > { %v263_v58 = vsel %vm262_vm10, 1, %v1053_v51  ;;  %v382_v0 = vshrl.u32 %v1052_v47, %v1166_v52  ;;  %v277_v1 = vshrl.u32 %v273_v28, 16  ;;  %v287_v2 = vadd.s32 %v285_v62, %v283_v59 }
  0xb6   : > { %v265_v61 = vadd.s32 %v263_v58, %v261_v39  ;;  %vm384_vm12 = vcmp.lt.s32.totalorder %v1205_v17, 1  ;;  %vm386_vm13 = vcmp.lt.s32.totalorder %v1205_v17, 3  ;;  %v279_v27 = vshrl.u32 %v274_v30, 16 }
  0xb7   : > { %v383_v4 = vor.u32 %v382_v0, %v381_v57  ;;  %vm387_vm14 = vcmp.lt.s32.totalorder %v1205_v17, 4  ;;  %v1230_v5 = vadd.s32 %v282_v54, %v278_v49  ;;  %v288_v11 = vadd.s32 %v287_v2, %v277_v1 }
  0xb8   : > { %v266_v3 = vadd.s32 %v265_v61, %v255_v41  ;;  %v392_v12 = vsel %vm384_vm12, %v1207_v18, %v1209_v21  ;;  %v393_v13 = vsel %vm387_vm14, %v380_v63, 920167782  ;;  %vm385_vm15 = vcmp.lt.s32.totalorder %v1205_v17, 2 }
  0xb9   : > { %v394_v19 = vsel %vm386_vm13, %v377_v60, %v393_v13  ;;  %v396_v20 = vsel %vm384_vm12, %v1209_v21, %v377_v60  ;;  %v236_v23 = vsel %vm230_vm7, %v233_v15, %v235_v16  ;;  %v289_v24 = vadd.s32 %v288_v11, %v279_v27 }
  0xba   : > { %v1238_v14 = vadd.s32 %v266_v3, %v257_v43  ;;  %v395_v28 = vsel %vm385_vm15, %v392_v12, %v394_v19  ;;  %v397_v30 = vsel %vm387_vm14, %v383_v4, 1326507024  ;;  %v402_v34 = vshrl.u32 %v1153_v40, 16 }
  0xbb   : > { %v398_v32 = vsel %vm386_vm13, %v380_v63, %v397_v30  ;;  %v425_v36 = vand.u32 65535, %v395_v28  ;;  %v293_v38 = vadd.s32 1, %v289_v24  ;;  %v426_v15 = vshrl.u32 %v395_v28, 16 }
  0xbc   : > { %vm292_vm0 = vc.u32 %v1238_v14, %v1230_v5  ;;  %v399_v26 = vsel %vm385_vm15, %v396_v20, %v398_v32  ;;  %v511_v16 = vshrl.u32 %v510_v55, 23  ;;  %v290_v25 = vmul.u32 %v1141_v22, %v236_v23 }
  0xbd   : > { %v403_v41 = vand.u32 65535, %v399_v26  ;;  %v404_v42 = vshrl.u32 %v399_v26, 16  ;;  %v294_v43 = vsel %vm292_vm0, %v293_v38, %v289_v24  ;;  %v368_v46 = vshrl.u32 %v1047_v29, %v1166_v52 }
  0xbe   : > { %v428_v48 = vmul.u32 %v426_v15, %v1199_v9  ;;  %v429_v49 = vmul.u32 %v425_v36, %v402_v34  ;;  %v295_v50 = vadd.s32 %v294_v43, %v290_v25  ;;  %v389_v53 = vsel %vm387_vm14, %v377_v60, 2102212464 }
  0xbf   : > { %v406_v54 = vmul.u32 %v404_v42, %v1199_v9  ;;  %v407_v56 = vmul.u32 %v403_v41, %v402_v34  ;;  %v427_v55 = vmul.u32 %v425_v36, %v1199_v9  ;;  %v430_v39 = vmul.u32 %v426_v15, %v402_v34 }
  0xc0   : > { %v431_v22 = vshll.u32 %v428_v48, 16  ;;  %v917_v44 = vadd.s32 4294967169, %v511_v16  ;;  %v296_v57 = vadd.s32 536870912, %v295_v50  ;;  %v405_v58 = vmul.u32 %v403_v41, %v1199_v9 }
  0xc1   : > { %v408_v59 = vmul.u32 %v404_v42, %v402_v34  ;;  %v409_v52 = vshll.u32 %v406_v54, 16  ;;  %v411_v61 = vshll.u32 %v407_v56, 16  ;;  %v433_v62 = vshll.u32 %v429_v49, 16 }
  0xc2   : > { %vm435_vm1 = vc.u32 %v427_v55, %v431_v22  ;;  %v437_v63 = vadd.s32 %v431_v22, %v427_v55  ;;  %v297_v0 = vshrl.u32 %v296_v57, 30  ;;  %v507_v27 = vand.u32 2147483647, %v1159_v45 }
  0xc3   : > { %vm413_vm2 = vc.u32 %v405_v58, %v409_v52  ;;  %v415_v60 = vadd.s32 %v409_v52, %v405_v58  ;;  %v436_v1 = vsel %vm435_vm1, 1, %v1053_v51  ;;  %v388_v9 = vsel %vm384_vm12, %v368_v46, %v1207_v18 }
  0xc4   : > { %v414_v2 = vsel %vm413_vm2, 1, %v1053_v51  ;;  %v438_v3 = vadd.s32 %v436_v1, %v430_v39  ;;  %vm439_vm3 = vc.u32 %v437_v63, %v433_v62  ;;  %v298_v4 = vshll.u32 %v297_v0, 30 }
  0xc5   : > { %v416_v11 = vadd.s32 %v414_v2, %v408_v59  ;;  %vm417_vm4 = vc.u32 %v415_v60, %v411_v61  ;;  %v390_v12 = vsel %vm386_vm13, %v1209_v21, %v389_v53  ;;  %v440_v19 = vsel %vm439_vm3, 1, %v1053_v51 }
  0xc6   : > { %v418_v13 = vsel %vm417_vm4, 1, %v1053_v51  ;;  %v517_v20 = vadd.s32 1, %v917_v44  ;;  %v299_v23 = vsub.s32 %v295_v50, %v298_v4  ;;  %v410_v24 = vshrl.u32 %v406_v54, 16 }
  0xc7   : > { %v420_v28 = vadd.s32 %v418_v13, %v416_v11  ;;  %v442_v30 = vadd.s32 %v440_v19, %v438_v3  ;;  %v432_v32 = vshrl.u32 %v428_v48, 16  ;;  %v412_v18 = vshrl.u32 %v407_v56, 16 }
  0xc8   : > { %vm518_vm5 = vcmp.gt.s32.totalorder %v517_v20, 0  ;;  %vm300_vm6 = vcmp.lt.s32.totalorder %v299_v23, 0  ;;  %v301_v34 = vsub.s32 0, %v299_v23  ;;  %v391_v38 = vsel %vm385_vm15, %v388_v9, %v390_v12 }
  0xc9   : > { %v421_v36 = vadd.s32 %v420_v28, %v410_v24  ;;  %v434_v26 = vshrl.u32 %v429_v49, 16  ;;  %v443_v21 = vadd.s32 %v442_v30, %v432_v32  ;;  %v519_v15 = vsel %vm518_vm5, %v517_v20, 0 }
  0xca   : > { %v302_v16 = vsel %vm300_vm6, %v301_v34, %v299_v23  ;;  %v321_v25 = vsub.s32 4, %v297_v0  ;;  %v514_v42 = vand.u32 8388607, %v507_v27  ;;  %v1287_v46 = vadd.s32 %v437_v63, %v433_v62 }
  0xcb   : > { %v1283_v41 = vadd.s32 %v421_v36, %v412_v18  ;;  %v303_v43 = vclz %v302_v16  ;;  %v444_v48 = vadd.s32 %v443_v21, %v434_v26  ;;  %v521_v50 = vand.u32 31, %v519_v15 }
  0xcc   : > { %vm1291_vm7 = vcmp.le.f32.partialorder %v197_v8, 0.7853982  ;;  %vm199_vm8 = vcmp.lt.s32.totalorder %v1129_v6, 0  ;;  %v291_v49 = vadd.s32 %v1230_v5, %v1238_v14  ;;  %v445_v53 = vmul.u32 %v1153_v40, %v391_v38 }
  0xcd   : > { %v912_v54 = vadd.s32 4294967294, %v303_v43  ;;  %vm447_vm9 = vc.u32 %v1283_v41, %v1287_v46  ;;  %v448_v56 = vadd.s32 1, %v444_v48  ;;  %v522_v55 = vsub.s32 32, %v521_v50 }
  0xce   : > { %v322_v39 = vsel %vm199_vm8, %v321_v25, %v297_v0  ;;  %v515_v8 = vor.u32 8388608, %v514_v42  ;;  %v1303_v22 = vshrl.u32 %v519_v15, 5  ;;  %v524_v44 = vshll.u32 %v1047_v29, %v521_v50 }
  0xcf   : > { %vm913_vm10 = vcmp.lt.s32.totalorder %v912_v54, 0  ;;  %v449_v57 = vsel %vm447_vm9, %v448_v56, %v444_v48  ;;  %v525_v5 = vshrl.u32 %v1048_v31, %v522_v55  ;;  %v527_v40 = vshll.u32 %v1048_v31, %v521_v50 }
  0xd0   : > { %v306_v14 = vsel %vm913_vm10, 0, %v912_v54  ;;  %v450_v58 = vadd.s32 %v449_v57, %v445_v53  ;;  %v528_v59 = vshrl.u32 %v1049_v33, %v522_v55  ;;  %v530_v52 = vshll.u32 %v1049_v33, %v521_v50 }
  0xd1   : > { %v307_v61 = vsub.s32 32, %v306_v14  ;;  %v311_v62 = vsub.s32 4294967266, %v306_v14  ;;  %v531_v63 = vshrl.u32 %v1050_v35, %v522_v55  ;;  %v533_v0 = vshll.u32 %v1050_v35, %v521_v50 }
  0xd2   : > { %v308_v60 = vshll.u32 %v299_v23, %v306_v14  ;;  %v451_v1 = vadd.s32 536870912, %v450_v58  ;;  %v526_v2 = vor.u32 %v525_v5, %v524_v44  ;;  %v534_v3 = vshrl.u32 %v1051_v37, %v522_v55 }
  0xd3   : > { %v309_v4 = vshrl.u32 %v291_v49, %v307_v61  ;;  %v312_v9 = vadd.s32 127, %v311_v62  ;;  %v1313_v11 = vor.u32 %v528_v59, %v527_v40  ;;  %v537_v12 = vshrl.u32 %v1052_v47, %v522_v55 }
  0xd4   : > { %v324_v13 = vsel %vm1291_vm7, 0, %v322_v39  ;;  %v1318_v19 = vshrl.u32 %v451_v1, 30  ;;  %v535_v20 = vor.u32 %v534_v3, %v533_v0  ;;  %v532_v30 = vor.u32 %v531_v63, %v530_v52 }
  0xd5   : > { %v310_v24 = vor.u32 %v309_v4, %v308_v60  ;;  %v313_v28 = vshll.u32 %v312_v9, 23  ;;  %v536_v23 = vshll.u32 %v1051_v37, %v521_v50  ;;  %vm539_vm11 = vcmp.lt.s32.totalorder %v1303_v22, 1 }
  0xd6   : > { %v453_v32 = vshll.u32 %v1318_v19, 30  ;;  %v1323_v34 = vshll.u32 %v515_v8, 8  ;;  %vm542_vm12 = vcmp.lt.s32.totalorder %v1303_v22, 4  ;;  %v547_v38 = vsel %vm539_vm11, %v526_v2, %v1313_v11 }
  0xd7   : > { %v314_v18 = vor.u32 4788187, %v313_v28  ;;  %v538_v36 = vor.u32 %v537_v12, %v536_v23  ;;  %v341_v26 = vadd.s32 3, %v324_v13  ;;  %vm541_vm13 = vcmp.lt.s32.totalorder %v1303_v22, 3 }
  0xd8   : > { %v1329_v21 = vsub.s32 %v450_v58, %v453_v32  ;;  %v548_v15 = vsel %vm542_vm12, %v535_v20, 920167782  ;;  %v317_v25 = vcvt.s32.f32 %v310_v24  ;;  %vm540_vm14 = vcmp.lt.s32.totalorder %v1303_v22, 2 }
  0xd9   : > { %v315_v16 = vand.u32 2147483647, %v314_v18  ;;  %v549_v42 = vsel %vm541_vm13, %v532_v30, %v548_v15  ;;  %v556_v50 = vand.u32 65535, %v1323_v34  ;;  %v551_v53 = vsel %vm539_vm11, %v1313_v11, %v532_v30 }
  0xda   : > { %vm455_vm15 = vcmp.lt.s32.totalorder %v1329_v21, 0  ;;  %v456_v43 = vsub.s32 0, %v1329_v21  ;;  %v550_v48 = vsel %vm540_vm14, %v547_v38, %v549_v42  ;;  %v552_v54 = vsel %vm542_vm12, %v538_v36, 1326507024 }
  0xdb   : > { %v318_v49 = vmul.f32 %v317_v25, %v315_v16  ;;  %v557_v56 = vshrl.u32 %v1323_v34, 16  ;;  %v523_v8 = vshrl.u32 %v1047_v29, %v522_v55  ;;  %v553_v44 = vsel %vm541_vm13, %v535_v20, %v552_v54 }
  0xdc   : > { %v457_v39 = vsel %vm455_vm15, %v456_v43, %v1329_v21  ;;  %v580_v57 = vand.u32 65535, %v550_v48  ;;  %v554_v14 = vsel %vm540_vm14, %v551_v53, %v553_v44  ;;  %v581_v58 = vshrl.u32 %v550_v48, 16 }
  0xdd   : > { %v319_v5 = vxor.u32 2147483648, %v318_v49  ;;  %v458_v40 = vclz %v457_v39  ;;  %v1354_v59 = vand.u32 3, %v341_v26  ;;  %v446_v52 = vadd.s32 %v1287_v46, %v1283_v41 }
  0xde   : > { %v476_v61 = vsub.s32 4, %v1318_v19  ;;  %v558_v62 = vand.u32 65535, %v554_v14  ;;  %v1363_v0 = vsel %vm539_vm11, %v523_v8, %v526_v2  ;;  %v559_v60 = vshrl.u32 %v554_v14, 16 }
  0xdf   : > { %v320_v55 = vsel %vm199_vm8, %v319_v5, %v318_v49  ;;  %v915_v63 = vadd.s32 4294967294, %v458_v40  ;;  %v1372_v41 = vsel %vm542_vm12, %v532_v30, 2102212464  ;;  %v582_v3 = vmul.u32 %v580_v57, %v556_v50 }
  0xe0   : > { %v1368_v1 = vsel %vm1291_vm7, %v1129_v6, %v320_v55  ;;  %v562_v46 = vmul.u32 %v558_v62, %v557_v56  ;;  %v561_v9 = vmul.u32 %v559_v60, %v556_v50  ;;  %v1376_v12 = vmul.u32 %v581_v58, %v556_v50 }
  0xe1   : > { %v325_v4 = vmul.f32 %v1368_v1, %v1368_v1  ;;  %vm916_vm0 = vcmp.lt.s32.totalorder %v915_v63, 0  ;;  %v560_v13 = vmul.u32 %v558_v62, %v556_v50  ;;  %v563_v20 = vmul.u32 %v559_v60, %v557_v56 }
  0xe2   : > { %v461_v2 = vsel %vm916_vm0, 0, %v915_v63  ;;  %v1378_v24 = vmul.u32 %v580_v57, %v557_v56  ;;  %v566_v32 = vshll.u32 %v562_v46, 16  ;;  %vm354_vm1 = vcmp.lt.s32.totalorder %v1131_v7, 0 }
  0xe3   : > { %v326_v17 = vmul.f32 -0.001358992, %v325_v4  ;;  %v333_v28 = vmul.f32 -0.00019511016, %v325_v4  ;;  %v462_v23 = vsub.s32 32, %v461_v2  ;;  %v466_v30 = vsub.s32 4294967266, %v461_v2 }
  0xe4   : > { %v564_v18 = vshll.u32 %v561_v9, 16  ;;  %v567_v36 = vshrl.u32 %v562_v46, 16  ;;  %v585_v38 = vmul.u32 %v581_v58, %v557_v56  ;;  %v463_v16 = vshll.u32 %v1329_v21, %v461_v2  ;;  %v1395_v2 = vpop.f32.mrf.mxu3 }
  0xe5   : > { %v327_v26 = vadd.f32 0.041655596, %v326_v17  ;;  %v334_v15 = vadd.f32 0.008332121, %v333_v28  ;;  %v464_v25 = vshrl.u32 %v446_v52, %v462_v23  ;;  %v467_v42 = vadd.s32 127, %v466_v30 }
  0xe6   : > { %vm568_vm2 = vc.u32 %v560_v13, %v564_v18  ;;  %v570_v43 = vadd.s32 %v564_v18, %v560_v13  ;;  %v586_v48 = vshll.u32 %v1376_v12, 16  ;;  %vm1386_vm3 = vcmp.le.f32.partialorder %v352_v10, 0.7853982 }
  0xe7   : > { %v328_v50 = vmul.f32 %v327_v26, %v325_v4  ;;  %v335_v49 = vmul.f32 %v334_v15, %v325_v4  ;;  %v465_v53 = vor.u32 %v464_v25, %v463_v16  ;;  %v569_v54 = vsel %vm568_vm2, 1, %v1053_v51 }
  0xe8   : > { %v468_v56 = vshll.u32 %v467_v42, 23  ;;  %v565_v8 = vshrl.u32 %v561_v9, 16  ;;  %v571_v21 = vadd.s32 %v569_v54, %v563_v20  ;;  %vm572_vm4 = vc.u32 %v570_v43, %v566_v32 }
  0xe9   : > { %v329_v44 = vadd.f32 -0.4999988, %v328_v50  ;;  %v336_v57 = vadd.f32 -0.16666654, %v335_v49  ;;  %v573_v5 = vsel %vm572_vm4, 1, %v1053_v51  ;;  %v588_v40 = vshll.u32 %v1378_v24, 16 }
  0xea   : > { %vm344_vm5 = vcmp.eq.s32.totalorder %v1354_v59, 0  ;;  %v469_v14 = vor.u32 4788187, %v468_v56  ;;  %v575_v58 = vadd.s32 %v573_v5, %v571_v21  ;;  %vm590_vm6 = vc.u32 %v582_v3, %v586_v48 }
  0xeb   : > { %v592_v10 = vadd.s32 %v586_v48, %v582_v3  ;;  %v330_v52 = vmul.f32 %v329_v44, %v325_v4  ;;  %v337_v62 = vmul.f32 %v336_v57, %v325_v4  ;;  %vm343_vm7 = vcmp.lt.s32.totalorder %v1354_v59, 2 }
  0xec   : > { %v472_v55 = vcvt.s32.f32 %v465_v53  ;;  %v591_v63 = vsel %vm590_vm6, 1, %v1053_v51  ;;  %v470_v60 = vand.u32 2147483647, %v469_v14  ;;  %v576_v46 = vadd.s32 %v575_v58, %v565_v8 }
  0xed   : > { %v593_v9 = vadd.s32 %v591_v63, %v585_v38  ;;  %vm594_vm8 = vc.u32 %v592_v10, %v588_v40  ;;  %v331_v13 = vadd.f32 1.0, %v330_v52  ;;  %v338_v20 = vadd.f32 1.0, %v337_v62 }
  0xee   : > { %v477_v3 = vsel %vm354_vm1, %v476_v61, %v1318_v19  ;;  %v595_v4 = vsel %vm594_vm8, 1, %v1053_v51  ;;  %v473_v17 = vmul.f32 %v472_v55, %v470_v60  ;;  %v1404_v28 = vadd.s32 %v576_v46, %v567_v36 }
  0xef   : > { %v587_v23 = vshrl.u32 %v1376_v12, 16  ;;  %v597_v32 = vadd.s32 %v595_v4, %v593_v9  ;;  %v339_v30 = vmul.f32 %v338_v20, %v1368_v1  ;;  %v348_v18 = vxor.u32 2147483648, %v331_v13 }
  0xf0   : > { %v545_v38 = vsel %vm541_vm13, %v1313_v11, %v1372_v41  ;;  %v665_v26 = vand.u32 2139095040, %v1395_v2  ;;  %v474_v19 = vxor.u32 2147483648, %v473_v17  ;;  %v589_v61 = vshrl.u32 %v1378_v24, 16 }
  0xf1   : > { %v1416_v36 = vadd.s32 %v592_v10, %v588_v40  ;;  %v598_v15 = vadd.s32 %v597_v32, %v587_v23  ;;  %v345_v12 = vxor.u32 2147483648, %v339_v30  ;;  %vm347_vm9 = vcmp.eq.s32.totalorder %v1354_v59, 2 }
  0xf2   : > { %v479_v1 = vsel %vm1386_vm3, 0, %v477_v3  ;;  %v666_v16 = vshrl.u32 %v665_v26, 23  ;;  %v475_v11 = vsel %vm354_vm1, %v474_v19, %v473_v17  ;;  %v546_v41 = vsel %vm540_vm14, %v1363_v0, %v545_v38 }
  0xf3   : > { %v599_v25 = vadd.s32 %v598_v15, %v589_v61  ;;  %vm602_vm10 = vc.u32 %v1404_v28, %v1416_v36  ;;  %v346_v24 = vsel %vm344_vm5, %v331_v13, %v345_v12  ;;  %v349_v42 = vsel %vm347_vm9, %v348_v18, %v339_v30 }
  0xf4   : > { %v478_v43 = vsel %vm1386_vm3, %v1131_v7, %v475_v11  ;;  %v920_v48 = vadd.s32 4294967169, %v666_v16  ;;  %vm340_vm11 = vweird.f32 %v1129_v6  ;;  %v350_v50 = vsel %vm343_vm7, %v346_v24, %v349_v42 }
  0xf5   : > { %v480_v22 = vmul.f32 %v478_v43, %v478_v43  ;;  %v603_v0 = vadd.s32 1, %v599_v25  ;;  %v351_v49 = vsel %vm340_vm11, nan, %v350_v50  ;;  %v600_v53 = vmul.u32 %v1323_v34, %v546_v41 }
  0xf6   : > { %v662_v54 = vand.u32 2147483647, %v1395_v2  ;;  %v672_v56 = vadd.s32 1, %v920_v48  ;;  %817 = vst [vmem:[%s1438_s4] sm:$0xff] %v351_v49  ;;  %v496_v21 = vadd.s32 3, %v479_v1  ;;  %vm495_vm14 = vweird.f32 %v1131_v7 }
  0xf7   : > { %v481_v39 = vmul.f32 -0.001358992, %v480_v22  ;;  %v488_v8 = vmul.f32 -0.00019511016, %v480_v22  ;;  %v604_v6 = vsel %vm602_vm10, %v603_v0, %v599_v25  ;;  %vm1512_vm7 = vcmp.le.f32.partialorder %v507_v27, 0.7853982 }
  0xf8   : > { %v605_v59 = vadd.s32 %v604_v6, %v600_v53  ;;  %vm673_vm12 = vcmp.gt.s32.totalorder %v672_v56, 0  ;;  %v497_v10 = vand.u32 3, %v496_v21  ;;  %v669_v52 = vand.u32 8388607, %v662_v54 }
  0xf9   : > { %v482_v44 = vadd.f32 0.041655596, %v481_v39  ;;  %v489_v57 = vadd.f32 0.008332121, %v488_v8  ;;  %v674_v5 = vsel %vm673_vm12, %v672_v56, 0  ;;  %v601_v39 = vadd.s32 %v1416_v36, %v1404_v28 }
  0xfa   : > { %v606_v34 = vadd.s32 536870912, %v605_v59  ;;  %v676_v40 = vand.u32 31, %v674_v5  ;;  %vm498_vm13 = vcmp.lt.s32.totalorder %v497_v10, 2  ;;  %v670_v20 = vor.u32 8388608, %v669_v52 }
  0xfb   : > { %v483_v14 = vmul.f32 %v482_v44, %v480_v22  ;;  %v490_v58 = vmul.f32 %v489_v57, %v480_v22  ;;  %v1452_v4 = vshrl.u32 %v674_v5, 5  ;;  %vm499_vm0 = vcmp.eq.s32.totalorder %v497_v10, 0 }
  0xfc   : > { %v1446_v62 = vshrl.u32 %v606_v34, 30  ;;  %v1448_v55 = vsub.s32 32, %v676_v40  ;;  %v679_v18 = vshll.u32 %v1047_v29, %v676_v40  ;;  %v682_v19 = vshll.u32 %v1048_v31, %v676_v40 }
  0xfd   : > { %v484_v63 = vadd.f32 -0.4999988, %v483_v14  ;;  %v491_v60 = vadd.f32 -0.16666654, %v490_v58  ;;  %v685_v1 = vshll.u32 %v1049_v33, %v676_v40  ;;  %v688_v16 = vshll.u32 %v1050_v35, %v676_v40 }
  0xfe   : > { %v608_v46 = vshll.u32 %v1446_v62, 30  ;;  %v680_v17 = vshrl.u32 %v1048_v31, %v1448_v55  ;;  %v683_v23 = vshrl.u32 %v1049_v33, %v1448_v55  ;;  %v689_v38 = vshrl.u32 %v1051_v37, %v1448_v55 }
  0xff   : > { %v485_v9 = vmul.f32 %v484_v63, %v480_v22  ;;  %v492_v13 = vmul.f32 %v491_v60, %v480_v22  ;;  %v686_v61 = vshrl.u32 %v1050_v35, %v1448_v55  ;;  %v692_v24 = vshrl.u32 %v1052_v47, %v1448_v55 }
 0x100   : > { %v609_v3 = vsub.s32 %v605_v59, %v608_v46  ;;  %v1466_v41 = vor.u32 %v680_v17, %v679_v18  ;;  %v1468_v25 = vor.u32 %v683_v23, %v682_v19  ;;  %v690_v48 = vor.u32 %v689_v38, %v688_v16 }
 0x101   : > { %v486_v32 = vadd.f32 1.0, %v485_v9  ;;  %v493_v30 = vadd.f32 1.0, %v492_v13  ;;  %vm502_vm1 = vcmp.eq.s32.totalorder %v497_v10, 2  ;;  %v691_v33 = vshll.u32 %v1051_v37, %v676_v40 }
 0x102   : > { %vm610_vm15 = vcmp.lt.s32.totalorder %v609_v3, 0  ;;  %v611_v26 = vsub.s32 0, %v609_v3  ;;  %v1475_v50 = vshll.u32 %v670_v20, 8  ;;  %vm694_vm2 = vcmp.lt.s32.totalorder %v1452_v4, 1 }
 0x103   : > { %v494_v15 = vmul.f32 %v493_v30, %v478_v43  ;;  %v503_v12 = vxor.u32 2147483648, %v486_v32  ;;  %v1472_v43 = vor.u32 %v686_v61, %v685_v1  ;;  %v693_v47 = vor.u32 %v692_v24, %v691_v33 }
 0x104   : > { %v612_v11 = vsel %vm610_vm15, %v611_v26, %v609_v3  ;;  %vm697_vm3 = vcmp.lt.s32.totalorder %v1452_v4, 4  ;;  %v702_v53 = vsel %vm694_vm2, %v1466_v41, %v1468_v25  ;;  %vm696_vm5 = vcmp.lt.s32.totalorder %v1452_v4, 3 }
 0x105   : > { %v500_v42 = vxor.u32 2147483648, %v494_v15  ;;  %v613_v31 = vclz %v612_v11  ;;  %v504_v22 = vsel %vm502_vm1, %v503_v12, %v494_v15  ;;  %v703_v56 = vsel %vm697_vm3, %v690_v48, 920167782 }
 0x106   : > { %vm695_vm6 = vcmp.lt.s32.totalorder %v1452_v4, 2  ;;  %v704_v21 = vsel %vm696_vm5, %v1472_v43, %v703_v56  ;;  %v706_v44 = vsel %vm694_vm2, %v1468_v25, %v1472_v43  ;;  %v707_v28 = vsel %vm697_vm3, %v693_v47, 1326507024 }
 0x107   : > { %v501_v35 = vsel %vm499_vm0, %v486_v32, %v500_v42  ;;  %v918_v0 = vadd.s32 4294967294, %v613_v31  ;;  %v705_v59 = vsel %vm695_vm6, %v702_v53, %v704_v21  ;;  %v711_v36 = vand.u32 65535, %v1475_v50 }
 0x108   : > { %v505_v49 = vsel %vm498_vm13, %v501_v35, %v504_v22  ;;  %v735_v57 = vand.u32 65535, %v705_v59  ;;  %v736_v5 = vshrl.u32 %v705_v59, 16  ;;  %v708_v58 = vsel %vm696_vm5, %v690_v48, %v707_v28 }
 0x109   : > { %v506_v37 = vsel %vm495_vm14, nan, %v505_v49  ;;  %vm919_vm4 = vcmp.lt.s32.totalorder %v918_v0, 0  ;;  %v709_v10 = vsel %vm695_vm6, %v706_v44, %v708_v58  ;;  %v712_v52 = vshrl.u32 %v1475_v50, 16 }
 0x10a   : > { %818 = vst [vmem:[%s1438_s4 + $0x8] sm:$0xff] %v506_v37  ;;  %v616_v8 = vsel %vm919_vm4, 0, %v918_v0  ;;  %v738_v63 = vmul.u32 %v736_v5, %v711_v36  ;;  %v713_v9 = vand.u32 65535, %v709_v10  ;;  %v714_v13 = vshrl.u32 %v709_v10, 16 }
 0x10b   : > { %v617_v6 = vsub.s32 32, %v616_v8  ;;  %v621_v7 = vsub.s32 4294967266, %v616_v8  ;;  %v618_v34 = vshll.u32 %v609_v3, %v616_v8  ;;  %v737_v20 = vmul.u32 %v735_v57, %v711_v36 }
 0x10c   : > { %v739_v17 = vmul.u32 %v735_v57, %v712_v52  ;;  %v741_v23 = vshll.u32 %v738_v63, 16  ;;  %vm509_vm8 = vcmp.lt.s32.totalorder %v1159_v45, 0  ;;  %v716_v30 = vmul.u32 %v714_v13, %v711_v36 }
 0x10d   : > { %v619_v40 = vshrl.u32 %v601_v39, %v617_v6  ;;  %v622_v14 = vadd.s32 127, %v621_v7  ;;  %v717_v38 = vmul.u32 %v713_v9, %v712_v52  ;;  %v740_v26 = vmul.u32 %v736_v5, %v712_v52 }
 0x10e   : > { %vm745_vm9 = vc.u32 %v737_v20, %v741_v23  ;;  %v715_v61 = vmul.u32 %v713_v9, %v711_v36  ;;  %v719_v15 = vshll.u32 %v716_v30, 16  ;;  %v718_v1 = vmul.u32 %v714_v13, %v712_v52 }
 0x10f   : > { %v620_v60 = vor.u32 %v619_v40, %v618_v34  ;;  %v623_v46 = vshll.u32 %v622_v14, 23  ;;  %v746_v12 = vsel %vm745_vm9, 1, %v1053_v51  ;;  %v743_v16 = vshll.u32 %v739_v17, 16 }
 0x110   : > { %v747_v11 = vadd.s32 %v741_v23, %v737_v20  ;;  %v748_v27 = vadd.s32 %v746_v12, %v740_v26  ;;  %v721_v42 = vshll.u32 %v717_v38, 16  ;;  %vm723_vm10 = vc.u32 %v715_v61, %v719_v15 }
 0x111   : > { %v624_v32 = vor.u32 4788187, %v623_v46  ;;  %v627_v18 = vcvt.s32.f32 %v620_v60  ;;  %v725_v31 = vadd.s32 %v719_v15, %v715_v61  ;;  %v678_v48 = vshrl.u32 %v1047_v29, %v1448_v55 }
 0x112   : > { %v699_v33 = vsel %vm697_vm3, %v1472_v43, 2102212464  ;;  %v724_v35 = vsel %vm723_vm10, 1, %v1053_v51  ;;  %vm749_vm11 = vc.u32 %v747_v11, %v743_v16  ;;  %v742_v37 = vshrl.u32 %v738_v63, 16 }
 0x113   : > { %v625_v19 = vand.u32 2147483647, %v624_v32  ;;  %v726_v0 = vadd.s32 %v724_v35, %v718_v1  ;;  %vm727_vm12 = vc.u32 %v725_v31, %v721_v42  ;;  %v750_v49 = vsel %vm749_vm11, 1, %v1053_v51 }
 0x114   : > { %v698_v47 = vsel %vm694_vm2, %v678_v48, %v1466_v41  ;;  %v728_v53 = vsel %vm727_vm12, 1, %v1053_v51  ;;  %v752_v29 = vadd.s32 %v750_v49, %v748_v27  ;;  %v700_v43 = vsel %vm696_vm5, %v1468_v25, %v699_v33 }
 0x115   : > { %v628_v24 = vmul.f32 %v627_v18, %v625_v19  ;;  %v720_v56 = vshrl.u32 %v716_v30, 16  ;;  %v730_v39 = vadd.s32 %v728_v53, %v726_v0  ;;  %v631_v8 = vsub.s32 4, %v1446_v62 }
 0x116   : > { %v744_v41 = vshrl.u32 %v739_v17, 16  ;;  %v753_v6 = vadd.s32 %v752_v29, %v742_v37  ;;  %v722_v7 = vshrl.u32 %v717_v38, 16  ;;  %v701_v44 = vsel %vm695_vm6, %v698_v47, %v700_v43 }
 0x117   : > { %v629_v22 = vxor.u32 2147483648, %v628_v24  ;;  %v731_v59 = vadd.s32 %v730_v39, %v720_v56  ;;  %v751_v5 = vadd.s32 %v747_v11, %v743_v16  ;;  %v632_v34 = vsel %vm509_vm8, %v631_v8, %v1446_v62 }
 0x118   : > { %v754_v28 = vadd.s32 %v753_v6, %v744_v41  ;;  %v755_v10 = vmul.u32 %v1475_v50, %v701_v44  ;;  %v634_v4 = vsel %vm1512_vm7, 0, %v632_v34  ;;  %vm650_vm2 = vweird.f32 %v1159_v45 }
 0x119   : > { %v630_v55 = vsel %vm509_vm8, %v629_v22, %v628_v24  ;;  %v732_v25 = vadd.s32 %v731_v59, %v722_v7  ;;  %v651_v17 = vadd.s32 3, %v634_v4  ;;  %vm664_vm4 = vcmp.lt.s32.totalorder %v1395_v2, 0 }
 0x11a   : > { %v633_v21 = vsel %vm1512_vm7, %v1159_v45, %v630_v55  ;;  %v758_v40 = vadd.s32 1, %v754_v28  ;;  %vm663_vm5 = vcmp.le.f32.partialorder %v662_v54, 0.7853982  ;;  %vm805_vm9 = vweird.f32 %v1395_v2 }
 0x11b   : > { %v635_v51 = vmul.f32 %v633_v21, %v633_v21  ;;  %vm757_vm13 = vc.u32 %v732_v25, %v751_v5  ;;  %v652_v26 = vand.u32 3, %v651_v17  ;;  %v756_v48 = vadd.s32 %v751_v5, %v732_v25 }
 0x11c   : > { %v759_v52 = vsel %vm757_vm13, %v758_v40, %v754_v28 }
 0x11d   : > { %v636_v36 = vmul.f32 -0.001358992, %v635_v51  ;;  %v643_v57 = vmul.f32 -0.00019511016, %v635_v51  ;;  %v760_v46 = vadd.s32 %v759_v52, %v755_v10  ;;  %vm654_vm15 = vcmp.eq.s32.totalorder %v652_v26, 0 }
 0x11e   : > { %vm657_vm0 = vcmp.eq.s32.totalorder %v652_v26, 2  ;;  %vm653_vm1 = vcmp.lt.s32.totalorder %v652_v26, 2 }
 0x11f   : > { %v637_v14 = vadd.f32 0.041655596, %v636_v36  ;;  %v644_v58 = vadd.f32 0.008332121, %v643_v57  ;;  %v761_v20 = vadd.s32 536870912, %v760_v46 }
 0x121   : > { %v638_v63 = vmul.f32 %v637_v14, %v635_v51  ;;  %v645_v60 = vmul.f32 %v644_v58, %v635_v51  ;;  %v762_v62 = vshrl.u32 %v761_v20, 30 }
 0x123   : > { %v639_v9 = vadd.f32 -0.4999988, %v638_v63  ;;  %v646_v13 = vadd.f32 -0.16666654, %v645_v60  ;;  %v763_v38 = vshll.u32 %v762_v62, 30  ;;  %v786_v39 = vsub.s32 4, %v762_v62 }
 0x125   : > { %v640_v23 = vmul.f32 %v639_v9, %v635_v51  ;;  %v647_v32 = vmul.f32 %v646_v13, %v635_v51  ;;  %v764_v61 = vsub.s32 %v760_v46, %v763_v38  ;;  %v787_v51 = vsel %vm664_vm4, %v786_v39, %v762_v62 }
 0x126   : > { %v789_v44 = vsel %vm663_vm5, 0, %v787_v51 }
 0x127   : > { %v641_v30 = vadd.f32 1.0, %v640_v23  ;;  %v648_v18 = vadd.f32 1.0, %v647_v32  ;;  %vm765_vm14 = vcmp.lt.s32.totalorder %v764_v61, 0  ;;  %v766_v15 = vsub.s32 0, %v764_v61 }
 0x128   : > { %v806_v5 = vadd.s32 3, %v789_v44 }
 0x129   : > { %v649_v50 = vmul.f32 %v648_v18, %v633_v21  ;;  %v658_v19 = vxor.u32 2147483648, %v641_v30  ;;  %v767_v16 = vsel %vm765_vm14, %v766_v15, %v764_v61 }
 0x12a   : > { %v768_v27 = vclz %v767_v16  ;;  %v807_v58 = vand.u32 3, %v806_v5 }
 0x12b   : > { %v655_v3 = vxor.u32 2147483648, %v649_v50  ;;  %v659_v1 = vsel %vm657_vm0, %v658_v19, %v649_v50 }
 0x12c   : > { %v921_v42 = vadd.s32 4294967294, %v768_v27  ;;  %vm809_vm6 = vcmp.eq.s32.totalorder %v807_v58, 0  ;;  %vm812_vm7 = vcmp.eq.s32.totalorder %v807_v58, 2  ;;  %vm808_vm8 = vcmp.lt.s32.totalorder %v807_v58, 2 }
 0x12d   : > { %v656_v12 = vsel %vm654_vm15, %v641_v30, %v655_v3 }
 0x12e   : > { %v660_v11 = vsel %vm653_vm1, %v656_v12, %v659_v1  ;;  %vm922_vm3 = vcmp.lt.s32.totalorder %v921_v42, 0 }
 0x12f   : > { %v661_v24 = vsel %vm650_vm2, nan, %v660_v11  ;;  %v771_v31 = vsel %vm922_vm3, 0, %v921_v42 }
 0x130   : > { %819 = vst [vmem:[%s1438_s4 + $0x10] sm:$0xff] %v661_v24  ;;  %v772_v33 = vsub.s32 32, %v771_v31  ;;  %v776_v35 = vsub.s32 4294967266, %v771_v31  ;;  %v773_v22 = vshll.u32 %v764_v61, %v771_v31 }
 0x132   : > { %v774_v0 = vshrl.u32 %v756_v48, %v772_v33  ;;  %v777_v49 = vadd.s32 127, %v776_v35 }
 0x134   : > { %v775_v47 = vor.u32 %v774_v0, %v773_v22  ;;  %v778_v53 = vshll.u32 %v777_v49, 23 }
 0x136   : > { %v779_v37 = vor.u32 4788187, %v778_v53  ;;  %v782_v55 = vcvt.s32.f32 %v775_v47 }
 0x138   : > { %v780_v29 = vand.u32 2147483647, %v779_v37 }
 0x13a   : > { %v783_v43 = vmul.f32 %v782_v55, %v780_v29 }
 0x13c   : > { %v784_v45 = vxor.u32 2147483648, %v783_v43 }
 0x13e   : > { %v785_v56 = vsel %vm664_vm4, %v784_v45, %v783_v43 }
 0x13f   : > { %v788_v8 = vsel %vm663_vm5, %v1395_v2, %v785_v56 }
 0x140   : > { %v790_v21 = vmul.f32 %v788_v8, %v788_v8 }
 0x142   : > { %v791_v41 = vmul.f32 -0.001358992, %v790_v21  ;;  %v798_v6 = vmul.f32 -0.00019511016, %v790_v21 }
 0x144   : > { %v792_v7 = vadd.f32 0.041655596, %v791_v41  ;;  %v799_v59 = vadd.f32 0.008332121, %v798_v6 }
 0x146   : > { %v793_v28 = vmul.f32 %v792_v7, %v790_v21  ;;  %v800_v36 = vmul.f32 %v799_v59, %v790_v21 }
 0x148   : > { %v794_v57 = vadd.f32 -0.4999988, %v793_v28  ;;  %v801_v25 = vadd.f32 -0.16666654, %v800_v36 }
 0x14a   : > { %v795_v54 = vmul.f32 %v794_v57, %v790_v21  ;;  %v802_v34 = vmul.f32 %v801_v25, %v790_v21 }
 0x14c   : > { %v796_v40 = vadd.f32 1.0, %v795_v54  ;;  %v803_v14 = vadd.f32 1.0, %v802_v34 }
 0x14e   : > { %v804_v10 = vmul.f32 %v803_v14, %v788_v8  ;;  %v813_v52 = vxor.u32 2147483648, %v796_v40 }
 0x150   : > { %v810_v4 = vxor.u32 2147483648, %v804_v10  ;;  %v814_v60 = vsel %vm812_vm7, %v813_v52, %v804_v10 }
 0x152   : > { %v811_v63 = vsel %vm809_vm6, %v796_v40, %v810_v4 }
 0x153   : > { %v815_v46 = vsel %vm808_vm8, %v811_v63, %v814_v60 }
 0x154   : > { %v816_v9 = vsel %vm805_vm9, nan, %v815_v46 }
 0x155   : > { %820 = vst [vmem:[%s1438_s4 + $0x18] sm:$0xff] %v816_v9 }
 0x156   : > { %1010 = shalt.err (!%p1007_p3)
}
 0x157   : > { %s1054_s27 = smov 128   ;;  %s1055_s28 = smov 8  }
 0x158   : > { %935 = dma.vmem_to_hbm [thread:$0]  (%p1109_p5), %s835_s14, 512, %s837_s16, %s822_s13, %s1054_s27, %s1054_s27, %s1055_s28  }
 0x159 PF: > { %p941_p4 = scmp.ge.s32.totalorder %s1045_s12, 2  ;;  %s851_s29 = sand.u32 1, %s1033_s9  }
 0x15a   : > { %s852_s30 = scalar_lea.sflag [#allocation3], %s851_s29 }
 0x15b   : > { %p938_p7 = pnand %p941_p4, %p1113_p6 }
 0x15d   : > { %p939_p8 = pneg %p938_p7 }
 0x15f   : > { %1028 = dma.done.wait (%p939_p8), %s852_s30, 512  }
 0x160   : > { %1030 = vsyncadd (%p939_p8), %s852_s30, 4294966784  ;;  %p12_p9 = scmp.ge.s32.totalorder %s1096_s15, 4   ;;  %s1599_s9 = smov %s1037_s10 }
 0x161   : > { %s1600_s10 = smov %s1041_s11  ;;  %s1601_s11 = smov %s1107_s18 }
 0x162   : > { %s1602_s12 = smov %s1096_s15  ;;  %14 = sbr.rel (!%p12_p9) target bundleno = 3 (0x3), region = 63 }
 0x167   :  { %858 = vsyncpa [#allocation3], 1 }
 0x168   :  { %860 = vsyncpa [#allocation3 + $0x1], 1 }

</bundles_post_ra>
